<compile_context>
chip_gen: v7x
topology: tpu7x:2x2x1
jax: 0.10.0
libtpu: 0.0.40
codegen_flags: <defaults>
</compile_context>

<pallas_src>
import jax
import jax.numpy as jnp
from jax.experimental import pallas as pl
from jax.experimental.pallas import tpu as pltpu


def a_msg_kernel(
    a_h_ref, x_ref, mask_ref,
    w1a_ref, w1x_ref, b1_ref,          # fused (edge||jump) first layer, split A/X halves
    ew2_ref, eb2_ref,                  # edge second layer: zero-padded row vector + scalar bias
    jw2_ref, jb2_ref,                  # jump second layer: zero-padded over the edge half
    aw1u_ref, aw1a_ref, ab1_ref, aw2_ref, ab2_ref,   # aggregation MLP (first layer split)
    a_out_ref, jump_out_ref,
):
    a_h = a_h_ref[...]                      # (TB, h)
    x = x_ref[...]                          # (TB, S, h)
    mask = mask_ref[...]                    # (TB, S)  (1.0 == masked out)
    TB, S, h = x.shape
    nh2 = w1a_ref.shape[1]                  # 2 * num_hidden  (edge || jump)

    # --- fused first layer for edge_wise + jump_wise (split-weight, no concat)
    ah_hid = jnp.dot(a_h, w1a_ref[...], preferred_element_type=jnp.float32)      # (TB, 2nh)
    x_hid = jnp.dot(x.reshape(TB * S, h), w1x_ref[...],
                    preferred_element_type=jnp.float32)                           # (TB*S, 2nh)
    hid = x_hid.reshape(TB, S, nh2) + ah_hid[:, None, :] + b1_ref[...][None]
    hid = jnp.maximum(hid, 0.0)                                                   # (TB, S, 2nh)

    # --- edge scores: VPU multiply + lane reduce (replaces the N=1 MXU matmul).
    #     ew2 is zero-padded over the jump half, so no lane-axis slice is needed,
    #     and the result already has S on the lane axis (no (B*S,1)->(B,S) relayout).
    edge = jnp.sum(hid * ew2_ref[...][None], axis=-1) + eb2_ref[...]              # (TB, S)

    # masked softmax over the sequence axis (True == masked out, as in PyTorch)
    edge = jnp.where(mask > 0.5, jnp.float32(-1e9), edge)
    m = jnp.max(edge, axis=1, keepdims=True)
    e = jnp.exp(edge - m)
    weight = e / jnp.sum(e, axis=1, keepdims=True)                                # (TB, S)

    # --- jump messages: second layer consumes the fused hidden directly
    #     (edge-half rows of jw2 are zero).
    jump = jnp.dot(hid.reshape(TB * S, nh2), jw2_ref[...],
                   preferred_element_type=jnp.float32) + jb2_ref[...]             # (TB*S, h)

    # weighted aggregation over the sequence (S is tiny: VPU mul + sublane reduce;
    # switch to jnp.einsum('bs,bsh->bh', ...) for large S).
    update = jnp.sum(jump.reshape(TB, S, h) * weight[:, :, None], axis=1)         # (TB, h)

    # --- aggregation_wise on cat(update, A_H): split-weight again (no concat)
    agg_hid = (jnp.dot(update, aw1u_ref[...], preferred_element_type=jnp.float32)
               + jnp.dot(a_h, aw1a_ref[...], preferred_element_type=jnp.float32)
               + ab1_ref[...])
    agg_hid = jnp.maximum(agg_hid, 0.0)
    upd = jnp.dot(agg_hid, aw2_ref[...], preferred_element_type=jnp.float32) + ab2_ref[...]

    a_out_ref[...] = a_h + upd
    jump_out_ref[...] = jump          # lane-dense (TB*S, h) slab


def make_mlp_params(key, dim_in, dim_out, num_hidden, sigma=0.01):
    k1, k2 = jax.random.split(key)
    w1 = sigma * jax.random.normal(k1, (dim_in, num_hidden), jnp.float32)
    b1 = jnp.zeros((1, num_hidden), jnp.float32)
    w2 = sigma * jax.random.normal(k2, (num_hidden, dim_out), jnp.float32)
    b2 = jnp.zeros((1, dim_out), jnp.float32)
    return w1, b1, w2, b2


def _prepare_params(params, h):
    """Pre-transform weights once (outside the kernel) for the fused layout."""
    (ew1, eb1, ew2, eb2), (jw1, jb1, jw2, jb2), (aw1, ab1, aw2, ab2) = params
    nh = ew1.shape[1]
    # fuse edge/jump first layers side-by-side; split A_H / x halves of W1
    w1a = jnp.concatenate([ew1[:h], jw1[:h]], axis=1)                        # (h, 2nh)
    w1x = jnp.concatenate([ew1[h:], jw1[h:]], axis=1)                        # (h, 2nh)
    b1 = jnp.concatenate([eb1, jb1], axis=1)                                 # (1, 2nh)
    # edge second layer as a zero-padded row vector (VPU lane reduce)
    ew2_row = jnp.concatenate([ew2.T, jnp.zeros((1, nh), ew2.dtype)], axis=1)  # (1, 2nh)
    eb2_s = eb2.reshape(1, 1)                                                # (1, 1)
    # jump second layer zero-padded over the edge half of the fused hidden
    jw2_pad = jnp.concatenate(
        [jnp.zeros((nh, jw2.shape[1]), jw2.dtype), jw2], axis=0)             # (2nh, h)
    # aggregation first layer split into update-half / A_H-half
    aw1u, aw1a = aw1[:h], aw1[h:]                                            # (h, nh) each
    return (w1a, w1x, b1, ew2_row, eb2_s, jw2_pad, jb2, aw1u, aw1a, ab1, aw2, ab2)


def a_msg_forward(a_h, x, seq_mask, params, *, batch_tile=None):
    B, S, h = x.shape
    if batch_tile is None:
        batch_tile = B if B <= 8 else 8          # small test: whole batch in one tile
    assert B % batch_tile == 0, "batch_tile must divide B"
    grid = (B // batch_tile,)

    flat_w = _prepare_params(params, h)
    nh2 = flat_w[0].shape[1]
    nh = nh2 // 2

    in_specs = [
        pl.BlockSpec((batch_tile, h), lambda i: (i, 0)),          # A_H
        pl.BlockSpec((batch_tile, S, h), lambda i: (i, 0, 0)),    # x
        pl.BlockSpec((batch_tile, S), lambda i: (i, 0)),          # seq_mask (float)
    ] + [pl.BlockSpec(w.shape, lambda i: (0, 0)) for w in flat_w]  # resident weights

    out_specs = (
        pl.BlockSpec((batch_tile, h), lambda i: (i, 0)),
        pl.BlockSpec((batch_tile * S, h), lambda i: (i, 0)),      # lane-dense jump slab
    )
    out_shape = (
        jax.ShapeDtypeStruct((B, h), jnp.float32),
        jax.ShapeDtypeStruct((B * S, h), jnp.float32),
    )

    flops = (2 * B * S * h * nh2          # fused first layer, x half
             + 2 * B * h * nh2            # fused first layer, A_H half
             + 2 * B * S * nh2            # edge VPU reduce
             + 2 * B * S * nh2 * h        # jump second layer
             + 2 * B * S * h              # weighted aggregation
             + 2 * B * (2 * h * nh + nh * h))   # aggregation MLP
    bytes_accessed = 4 * (a_h.size + x.size + seq_mask.size
                          + sum(int(w.size) for w in flat_w)
                          + B * h + B * S * h)

    a_new, jump2d = pl.pallas_call(
        a_msg_kernel,
        grid=grid,
        in_specs=in_specs,
        out_specs=out_specs,
        out_shape=out_shape,
        compiler_params=pltpu.CompilerParams(
            dimension_semantics=("parallel",),      # megacore / v7x 2nd TC
            vmem_limit_bytes=32 * 1024 * 1024,      # raises v5e scoped default (16 MiB)
        ),
        cost_estimate=pl.CostEstimate(
            flops=int(flops), transcendentals=int(B * S),
            bytes_accessed=int(bytes_accessed)),
    )(a_h, x, seq_mask.astype(jnp.float32), *flat_w)

    return a_new, jump2d.reshape(B, S, h)


def a_msg_reference(a_h, x, seq_mask, params):
    # Pure-JAX reference of the PyTorch forward (for sanity checking).
    (ew1, eb1, ew2, eb2), (jw1, jb1, jw2, jb2), (aw1, ab1, aw2, ab2) = params

    def mlp(z, w1, b1, w2, b2):
        return jnp.maximum(z @ w1 + b1, 0.0) @ w2 + b2

    B, S, h = x.shape
    agg = jnp.broadcast_to(a_h[:, None, :], (B, S, h))
    cat = jnp.concatenate([agg, x], axis=-1)
    edge = mlp(cat.reshape(B * S, 2 * h), ew1, eb1, ew2, eb2).reshape(B, S)
    edge = jnp.where(seq_mask, -1e9, edge)
    weight = jax.nn.softmax(edge, axis=1)
    jump = mlp(cat.reshape(B * S, 2 * h), jw1, jb1, jw2, jb2).reshape(B, S, h)
    update = jnp.sum(jump * weight[:, :, None], axis=1)
    upd = mlp(jnp.concatenate([update, a_h], axis=-1), aw1, ab1, aw2, ab2)
    return a_h + upd, jump


if __name__ == "__main__":
    # Small, forward-implied shapes.
    B, S = 2, 8            # batch, sequence length
    h_dim = 32             # vertex hidden dim
    num_hidden = 32        # MLP hidden width

    key = jax.random.PRNGKey(0)
    k_ah, k_x, k_m, k_e, k_j, k_a = jax.random.split(key, 6)

    a_h = jax.random.normal(k_ah, (B, h_dim), jnp.float32)
    x = jax.random.normal(k_x, (B, S, h_dim), jnp.float32)
    # boolean mask: True = position is masked out (PyTorch masked_fill_ polarity)
    seq_mask = jax.random.uniform(k_m, (B, S)) < 0.25

    params = (
        make_mlp_params(k_e, 2 * h_dim, 1, num_hidden),       # edge_wise
        make_mlp_params(k_j, 2 * h_dim, h_dim, num_hidden),   # jump_wise
        make_mlp_params(k_a, 2 * h_dim, h_dim, num_hidden),   # aggregation_wise
    )

    a_h_new, jump = jax.block_until_ready(a_msg_forward(a_h, x, seq_mask, params))
    a_h_ref, jump_ref = a_msg_reference(a_h, x, seq_mask, params)

    assert a_h_new.shape == (B, h_dim) and jump.shape == (B, S, h_dim)
    assert jnp.allclose(a_h_new, a_h_ref, atol=1e-5, rtol=1e-5)
    assert jnp.allclose(jump, jump_ref, atol=1e-5, rtol=1e-5)

    print("KERNEL_OK")
</pallas_src>

<mosaic_0001>
module attributes {stable_mosaic.version = 11 : i64} {
  func.func @a_msg_kernel(%arg0: i32, %arg1: memref<2x32xf32, #tpu.memory_space<vmem>>, %arg2: memref<2x8x32xf32, #tpu.memory_space<vmem>>, %arg3: memref<2x8xf32, #tpu.memory_space<vmem>>, %arg4: memref<32x64xf32, #tpu.memory_space<vmem>>, %arg5: memref<32x64xf32, #tpu.memory_space<vmem>>, %arg6: memref<1x64xf32, #tpu.memory_space<vmem>>, %arg7: memref<1x64xf32, #tpu.memory_space<vmem>>, %arg8: memref<1x1xf32, #tpu.memory_space<vmem>>, %arg9: memref<64x32xf32, #tpu.memory_space<vmem>>, %arg10: memref<1x32xf32, #tpu.memory_space<vmem>>, %arg11: memref<32x32xf32, #tpu.memory_space<vmem>>, %arg12: memref<32x32xf32, #tpu.memory_space<vmem>>, %arg13: memref<1x32xf32, #tpu.memory_space<vmem>>, %arg14: memref<32x32xf32, #tpu.memory_space<vmem>>, %arg15: memref<1x32xf32, #tpu.memory_space<vmem>>, %arg16: memref<2x32xf32, #tpu.memory_space<vmem>>, %arg17: memref<16x32xf32, #tpu.memory_space<vmem>>) attributes {dimension_semantics = [#tpu.dimension_semantics<parallel>], iteration_bounds = array<i64: 1>, scalar_prefetch = 0 : i64, scratch_operands = 0 : i64, tpu.core_type = #tpu.core_type<tc>, window_params = [{transform_indices = @transform_0, window_bounds = array<i64: 2, 32>}, {transform_indices = @transform_1, window_bounds = array<i64: 2, 8, 32>}, {transform_indices = @transform_2, window_bounds = array<i64: 2, 8>}, {pipeline_mode = #tpu.pipeline_mode<synchronous>, transform_indices = @transform_3, window_bounds = array<i64: 32, 64>}, {pipeline_mode = #tpu.pipeline_mode<synchronous>, transform_indices = @transform_4, window_bounds = array<i64: 32, 64>}, {pipeline_mode = #tpu.pipeline_mode<synchronous>, transform_indices = @transform_5, window_bounds = array<i64: 1, 64>}, {pipeline_mode = #tpu.pipeline_mode<synchronous>, transform_indices = @transform_6, window_bounds = array<i64: 1, 64>}, {pipeline_mode = #tpu.pipeline_mode<synchronous>, transform_indices = @transform_7, window_bounds = array<i64: 1, 1>}, {pipeline_mode = #tpu.pipeline_mode<synchronous>, transform_indices = @transform_8, window_bounds = array<i64: 64, 32>}, {pipeline_mode = #tpu.pipeline_mode<synchronous>, transform_indices = @transform_9, window_bounds = array<i64: 1, 32>}, {pipeline_mode = #tpu.pipeline_mode<synchronous>, transform_indices = @transform_10, window_bounds = array<i64: 32, 32>}, {pipeline_mode = #tpu.pipeline_mode<synchronous>, transform_indices = @transform_11, window_bounds = array<i64: 32, 32>}, {pipeline_mode = #tpu.pipeline_mode<synchronous>, transform_indices = @transform_12, window_bounds = array<i64: 1, 32>}, {pipeline_mode = #tpu.pipeline_mode<synchronous>, transform_indices = @transform_13, window_bounds = array<i64: 32, 32>}, {pipeline_mode = #tpu.pipeline_mode<synchronous>, transform_indices = @transform_14, window_bounds = array<i64: 1, 32>}, {transform_indices = @transform_15, window_bounds = array<i64: 2, 32>}, {transform_indices = @transform_16, window_bounds = array<i64: 16, 32>}]} {
    %c0 = arith.constant 0 : index
    %c0_0 = arith.constant 0 : index
    %0 = vector.load %arg1[%c0, %c0_0] : memref<2x32xf32, #tpu.memory_space<vmem>>, vector<2x32xf32>
    %c0_1 = arith.constant 0 : index
    %c0_2 = arith.constant 0 : index
    %c0_3 = arith.constant 0 : index
    %1 = vector.load %arg2[%c0_1, %c0_2, %c0_3] : memref<2x8x32xf32, #tpu.memory_space<vmem>>, vector<2x8x32xf32>
    %c0_4 = arith.constant 0 : index
    %c0_5 = arith.constant 0 : index
    %2 = vector.load %arg3[%c0_4, %c0_5] : memref<2x8xf32, #tpu.memory_space<vmem>>, vector<2x8xf32>
    %c0_6 = arith.constant 0 : index
    %c0_7 = arith.constant 0 : index
    %3 = vector.load %arg4[%c0_6, %c0_7] : memref<32x64xf32, #tpu.memory_space<vmem>>, vector<32x64xf32>
    %cst = arith.constant dense<0.000000e+00> : vector<2x64xf32>
    %4 = tpu.matmul %0, %3, %cst {dimension_numbers = #tpu.dot_dimension_numbers<[1], [0], [0], [1], [0, 0, 1, 1], [], []>} : vector<2x32xf32>, vector<32x64xf32>, vector<2x64xf32> -> vector<2x64xf32>
    %5 = vector.shape_cast %1 : vector<2x8x32xf32> to vector<16x32xf32>
    %c0_8 = arith.constant 0 : index
    %c0_9 = arith.constant 0 : index
    %6 = vector.load %arg5[%c0_8, %c0_9] : memref<32x64xf32, #tpu.memory_space<vmem>>, vector<32x64xf32>
    %cst_10 = arith.constant dense<0.000000e+00> : vector<16x64xf32>
    %7 = tpu.matmul %5, %6, %cst_10 {dimension_numbers = #tpu.dot_dimension_numbers<[1], [0], [0], [1], [0, 0, 1, 1], [], []>} : vector<16x32xf32>, vector<32x64xf32>, vector<16x64xf32> -> vector<16x64xf32>
    %8 = vector.shape_cast %7 : vector<16x64xf32> to vector<2x8x64xf32>
    %9 = vector.shape_cast %4 : vector<2x64xf32> to vector<2x1x64xf32>
    %10 = vector.broadcast %9 : vector<2x1x64xf32> to vector<2x8x64xf32>
    %11 = arith.addf %8, %10 : vector<2x8x64xf32>
    %c0_11 = arith.constant 0 : index
    %c0_12 = arith.constant 0 : index
    %12 = vector.load %arg6[%c0_11, %c0_12] : memref<1x64xf32, #tpu.memory_space<vmem>>, vector<1x64xf32>
    %13 = vector.shape_cast %12 : vector<1x64xf32> to vector<1x1x64xf32>
    %14 = vector.broadcast %13 : vector<1x1x64xf32> to vector<2x8x64xf32>
    %15 = arith.addf %11, %14 : vector<2x8x64xf32>
    %cst_13 = arith.constant 0.000000e+00 : f32
    %16 = vector.broadcast %cst_13 : f32 to vector<2x8x64xf32>
    %17 = arith.maximumf %15, %16 : vector<2x8x64xf32>
    %c0_14 = arith.constant 0 : index
    %c0_15 = arith.constant 0 : index
    %18 = vector.load %arg7[%c0_14, %c0_15] : memref<1x64xf32, #tpu.memory_space<vmem>>, vector<1x64xf32>
    %19 = vector.shape_cast %18 : vector<1x64xf32> to vector<1x1x64xf32>
    %20 = vector.broadcast %19 : vector<1x1x64xf32> to vector<2x8x64xf32>
    %21 = arith.mulf %17, %20 : vector<2x8x64xf32>
    %cst_16 = arith.constant dense<0.000000e+00> : vector<2x8xf32>
    %22 = vector.multi_reduction <add>, %21, %cst_16 [2] : vector<2x8x64xf32> to vector<2x8xf32>
    %c0_17 = arith.constant 0 : index
    %c0_18 = arith.constant 0 : index
    %23 = vector.load %arg8[%c0_17, %c0_18] : memref<1x1xf32, #tpu.memory_space<vmem>>, vector<1x1xf32>
    %24 = vector.broadcast %23 : vector<1x1xf32> to vector<2x8xf32>
    %25 = arith.addf %22, %24 : vector<2x8xf32>
    %cst_19 = arith.constant 5.000000e-01 : f32
    %26 = vector.broadcast %cst_19 : f32 to vector<2x8xf32>
    %27 = arith.cmpf ogt, %2, %26 : vector<2x8xf32>
    %cst_20 = arith.constant -1.000000e+09 : f32
    %28 = vector.broadcast %cst_20 : f32 to vector<2x8xf32>
    %29 = arith.select %27, %28, %25 : vector<2x8xi1>, vector<2x8xf32>
    %cst_21 = arith.constant dense<0xFF800000> : vector<2xf32>
    %30 = vector.multi_reduction <maximumf>, %29, %cst_21 [1] : vector<2x8xf32> to vector<2xf32>
    %31 = vector.shape_cast %30 : vector<2xf32> to vector<2x1xf32>
    %32 = vector.broadcast %31 : vector<2x1xf32> to vector<2x8xf32>
    %33 = arith.subf %29, %32 : vector<2x8xf32>
    %34 = math.exp %33 : vector<2x8xf32>
    %cst_22 = arith.constant dense<0.000000e+00> : vector<2xf32>
    %35 = vector.multi_reduction <add>, %34, %cst_22 [1] : vector<2x8xf32> to vector<2xf32>
    %36 = vector.shape_cast %35 : vector<2xf32> to vector<2x1xf32>
    %37 = vector.broadcast %36 : vector<2x1xf32> to vector<2x8xf32>
    %38 = arith.divf %34, %37 : vector<2x8xf32>
    %39 = vector.shape_cast %17 : vector<2x8x64xf32> to vector<16x64xf32>
    %c0_23 = arith.constant 0 : index
    %c0_24 = arith.constant 0 : index
    %40 = vector.load %arg9[%c0_23, %c0_24] : memref<64x32xf32, #tpu.memory_space<vmem>>, vector<64x32xf32>
    %cst_25 = arith.constant dense<0.000000e+00> : vector<16x32xf32>
    %41 = tpu.matmul %39, %40, %cst_25 {dimension_numbers = #tpu.dot_dimension_numbers<[1], [0], [0], [1], [0, 0, 1, 1], [], []>} : vector<16x64xf32>, vector<64x32xf32>, vector<16x32xf32> -> vector<16x32xf32>
    %c0_26 = arith.constant 0 : index
    %c0_27 = arith.constant 0 : index
    %42 = vector.load %arg10[%c0_26, %c0_27] : memref<1x32xf32, #tpu.memory_space<vmem>>, vector<1x32xf32>
    %43 = vector.broadcast %42 : vector<1x32xf32> to vector<16x32xf32>
    %44 = arith.addf %41, %43 : vector<16x32xf32>
    %45 = vector.shape_cast %44 : vector<16x32xf32> to vector<2x8x32xf32>
    %46 = vector.shape_cast %38 : vector<2x8xf32> to vector<2x8x1xf32>
    %47 = vector.broadcast %46 : vector<2x8x1xf32> to vector<2x8x32xf32>
    %48 = arith.mulf %45, %47 : vector<2x8x32xf32>
    %cst_28 = arith.constant dense<0.000000e+00> : vector<2x32xf32>
    %49 = vector.multi_reduction <add>, %48, %cst_28 [1] : vector<2x8x32xf32> to vector<2x32xf32>
    %c0_29 = arith.constant 0 : index
    %c0_30 = arith.constant 0 : index
    %50 = vector.load %arg11[%c0_29, %c0_30] : memref<32x32xf32, #tpu.memory_space<vmem>>, vector<32x32xf32>
    %cst_31 = arith.constant dense<0.000000e+00> : vector<2x32xf32>
    %51 = tpu.matmul %49, %50, %cst_31 {dimension_numbers = #tpu.dot_dimension_numbers<[1], [0], [0], [1], [0, 0, 1, 1], [], []>} : vector<2x32xf32>, vector<32x32xf32>, vector<2x32xf32> -> vector<2x32xf32>
    %c0_32 = arith.constant 0 : index
    %c0_33 = arith.constant 0 : index
    %52 = vector.load %arg12[%c0_32, %c0_33] : memref<32x32xf32, #tpu.memory_space<vmem>>, vector<32x32xf32>
    %cst_34 = arith.constant dense<0.000000e+00> : vector<2x32xf32>
    %53 = tpu.matmul %0, %52, %cst_34 {dimension_numbers = #tpu.dot_dimension_numbers<[1], [0], [0], [1], [0, 0, 1, 1], [], []>} : vector<2x32xf32>, vector<32x32xf32>, vector<2x32xf32> -> vector<2x32xf32>
    %54 = arith.addf %51, %53 : vector<2x32xf32>
    %c0_35 = arith.constant 0 : index
    %c0_36 = arith.constant 0 : index
    %55 = vector.load %arg13[%c0_35, %c0_36] : memref<1x32xf32, #tpu.memory_space<vmem>>, vector<1x32xf32>
    %56 = vector.broadcast %55 : vector<1x32xf32> to vector<2x32xf32>
    %57 = arith.addf %54, %56 : vector<2x32xf32>
    %cst_37 = arith.constant 0.000000e+00 : f32
    %58 = vector.broadcast %cst_37 : f32 to vector<2x32xf32>
    %59 = arith.maximumf %57, %58 : vector<2x32xf32>
    %c0_38 = arith.constant 0 : index
    %c0_39 = arith.constant 0 : index
    %60 = vector.load %arg14[%c0_38, %c0_39] : memref<32x32xf32, #tpu.memory_space<vmem>>, vector<32x32xf32>
    %cst_40 = arith.constant dense<0.000000e+00> : vector<2x32xf32>
    %61 = tpu.matmul %59, %60, %cst_40 {dimension_numbers = #tpu.dot_dimension_numbers<[1], [0], [0], [1], [0, 0, 1, 1], [], []>} : vector<2x32xf32>, vector<32x32xf32>, vector<2x32xf32> -> vector<2x32xf32>
    %c0_41 = arith.constant 0 : index
    %c0_42 = arith.constant 0 : index
    %62 = vector.load %arg15[%c0_41, %c0_42] : memref<1x32xf32, #tpu.memory_space<vmem>>, vector<1x32xf32>
    %63 = vector.broadcast %62 : vector<1x32xf32> to vector<2x32xf32>
    %64 = arith.addf %61, %63 : vector<2x32xf32>
    %65 = arith.addf %0, %64 : vector<2x32xf32>
    %c0_43 = arith.constant 0 : index
    %c0_44 = arith.constant 0 : index
    %66 = vector.load %arg16[%c0_43, %c0_44] : memref<2x32xf32, #tpu.memory_space<vmem>>, vector<2x32xf32>
    tpu.vector_store %arg16[%c0_43, %c0_44], %65 {strides = array<i32>} : memref<2x32xf32, #tpu.memory_space<vmem>>, vector<2x32xf32>,
    %c0_45 = arith.constant 0 : index
    %c0_46 = arith.constant 0 : index
    %67 = vector.load %arg17[%c0_45, %c0_46] : memref<16x32xf32, #tpu.memory_space<vmem>>, vector<16x32xf32>
    tpu.vector_store %arg17[%c0_45, %c0_46], %44 {strides = array<i32>} : memref<16x32xf32, #tpu.memory_space<vmem>>, vector<16x32xf32>,
    return
  }
  func.func @transform_0(%arg0: i32) -> (i32, i32) {
    %c0_i32 = arith.constant 0 : i32
    %c0_i32_0 = arith.constant 0 : i32
    return %arg0, %c0_i32 : i32, i32
  }
  func.func @transform_1(%arg0: i32) -> (i32, i32, i32) {
    %c0_i32 = arith.constant 0 : i32
    %c0_i32_0 = arith.constant 0 : i32
    %c0_i32_1 = arith.constant 0 : i32
    return %arg0, %c0_i32, %c0_i32_0 : i32, i32, i32
  }
  func.func @transform_2(%arg0: i32) -> (i32, i32) {
    %c0_i32 = arith.constant 0 : i32
    %c0_i32_0 = arith.constant 0 : i32
    return %arg0, %c0_i32 : i32, i32
  }
  func.func @transform_3(%arg0: i32) -> (i32, i32) {
    %c0_i32 = arith.constant 0 : i32
    %c0_i32_0 = arith.constant 0 : i32
    %c0_i32_1 = arith.constant 0 : i32
    return %c0_i32, %c0_i32_0 : i32, i32
  }
  func.func @transform_4(%arg0: i32) -> (i32, i32) {
    %c0_i32 = arith.constant 0 : i32
    %c0_i32_0 = arith.constant 0 : i32
    %c0_i32_1 = arith.constant 0 : i32
    return %c0_i32, %c0_i32_0 : i32, i32
  }
  func.func @transform_5(%arg0: i32) -> (i32, i32) {
    %c0_i32 = arith.constant 0 : i32
    %c0_i32_0 = arith.constant 0 : i32
    %c0_i32_1 = arith.constant 0 : i32
    return %c0_i32, %c0_i32_0 : i32, i32
  }
  func.func @transform_6(%arg0: i32) -> (i32, i32) {
    %c0_i32 = arith.constant 0 : i32
    %c0_i32_0 = arith.constant 0 : i32
    %c0_i32_1 = arith.constant 0 : i32
    return %c0_i32, %c0_i32_0 : i32, i32
  }
  func.func @transform_7(%arg0: i32) -> (i32, i32) {
    %c0_i32 = arith.constant 0 : i32
    %c0_i32_0 = arith.constant 0 : i32
    %c0_i32_1 = arith.constant 0 : i32
    return %c0_i32, %c0_i32_0 : i32, i32
  }
  func.func @transform_8(%arg0: i32) -> (i32, i32) {
    %c0_i32 = arith.constant 0 : i32
    %c0_i32_0 = arith.constant 0 : i32
    %c0_i32_1 = arith.constant 0 : i32
    return %c0_i32, %c0_i32_0 : i32, i32
  }
  func.func @transform_9(%arg0: i32) -> (i32, i32) {
    %c0_i32 = arith.constant 0 : i32
    %c0_i32_0 = arith.constant 0 : i32
    %c0_i32_1 = arith.constant 0 : i32
    return %c0_i32, %c0_i32_0 : i32, i32
  }
  func.func @transform_10(%arg0: i32) -> (i32, i32) {
    %c0_i32 = arith.constant 0 : i32
    %c0_i32_0 = arith.constant 0 : i32
    %c0_i32_1 = arith.constant 0 : i32
    return %c0_i32, %c0_i32_0 : i32, i32
  }
  func.func @transform_11(%arg0: i32) -> (i32, i32) {
    %c0_i32 = arith.constant 0 : i32
    %c0_i32_0 = arith.constant 0 : i32
    %c0_i32_1 = arith.constant 0 : i32
    return %c0_i32, %c0_i32_0 : i32, i32
  }
  func.func @transform_12(%arg0: i32) -> (i32, i32) {
    %c0_i32 = arith.constant 0 : i32
    %c0_i32_0 = arith.constant 0 : i32
    %c0_i32_1 = arith.constant 0 : i32
    return %c0_i32, %c0_i32_0 : i32, i32
  }
  func.func @transform_13(%arg0: i32) -> (i32, i32) {
    %c0_i32 = arith.constant 0 : i32
    %c0_i32_0 = arith.constant 0 : i32
    %c0_i32_1 = arith.constant 0 : i32
    return %c0_i32, %c0_i32_0 : i32, i32
  }
  func.func @transform_14(%arg0: i32) -> (i32, i32) {
    %c0_i32 = arith.constant 0 : i32
    %c0_i32_0 = arith.constant 0 : i32
    %c0_i32_1 = arith.constant 0 : i32
    return %c0_i32, %c0_i32_0 : i32, i32
  }
  func.func @transform_15(%arg0: i32) -> (i32, i32) {
    %c0_i32 = arith.constant 0 : i32
    %c0_i32_0 = arith.constant 0 : i32
    return %arg0, %c0_i32 : i32, i32
  }
  func.func @transform_16(%arg0: i32) -> (i32, i32) {
    %c0_i32 = arith.constant 0 : i32
    %c0_i32_0 = arith.constant 0 : i32
    return %arg0, %c0_i32 : i32, i32
  }
}

</mosaic_0001>

<bundles_post_ra>
// kernel: tpu_custom_call.1
= control target key start
LH: loop header
LB: loop body
LE: loop exit
PB: predicated region body
PF: predicated region fallthrough
CT: control target
= control target key end

     0   :  { %s1527_s0 = inlined_call_operand.vmem [shape: f32[2,32], index: 0, kind: input, shape index: {}]   ;;  %s1528_s1 = inlined_call_operand.hbm [shape: f32[2,8,32], index: 1, kind: input, shape index: {}]   ;;  %s1529_s2 = inlined_call_operand.hbm [shape: f32[2,8], index: 2, kind: input, shape index: {}]   ;;  %s1530_s3 = inlined_call_operand.vmem [shape: f32[32,64], index: 3, kind: input, shape index: {}]   ;;  %s1531_s4 = inlined_call_operand.vmem [shape: f32[32,64], index: 4, kind: input, shape index: {}]   ;;  %s1532_s5 = inlined_call_operand.hbm [shape: f32[1,64], index: 5, kind: input, shape index: {}]   ;;  %s1533_s6 = inlined_call_operand.hbm [shape: f32[1,64], index: 6, kind: input, shape index: {}]   ;;  %s1534_s7 = inlined_call_operand.<no memory space> [shape: f32[1,1], index: 7, kind: input, shape index: {}]   ;;  %s1535_s8 = inlined_call_operand.vmem [shape: f32[64,32], index: 8, kind: input, shape index: {}]   ;;  %s1536_s9 = inlined_call_operand.hbm [shape: f32[1,32], index: 9, kind: input, shape index: {}]   ;;  %s1537_s10 = inlined_call_operand.vmem [shape: f32[32,32], index: 10, kind: input, shape index: {}]   ;;  %s1538_s11 = inlined_call_operand.vmem [shape: f32[32,32], index: 11, kind: input, shape index: {}]   ;;  %s1539_s12 = inlined_call_operand.vmem [shape: f32[1,32], index: 12, kind: input, shape index: {}]   ;;  %s1540_s13 = inlined_call_operand.hbm [shape: f32[32,32], index: 13, kind: input, shape index: {}]   ;;  %s1541_s14 = inlined_call_operand.vmem [shape: f32[1,32], index: 14, kind: input, shape index: {}]   ;;  %s1542_s15 = inlined_call_operand.hbm [shape: f32[2,32], index: 15, kind: output, shape index: {0}]   ;;  %s1543_s16 = inlined_call_operand.hbm [shape: f32[16,32], index: 16, kind: output, shape index: {1}]  }
   0x1   :  { %1544 = sst [smem:[#allocation23_spill]] %s1527_s0  ;;  %v22_v0 = vstv %s1534_s7 }
   0x2   :  { %23 = vst [vmem:[#allocation2] sm:$0x1] %v22_v0 }
   0x3   :  { %24 = vsyncpa [#allocation4], 0 }
   0x4   :  { %25 = vsyncpa [#allocation7], 0 }
   0x5   :  { %26 = vsyncpa [#allocation10], 0 }
   0x6   :  { %27 = vsyncpa [#allocation13], 0 }
   0x7   :  { %28 = vsyncpa [#allocation5], 0 }
   0x8   :  { %29 = vsyncpa [#allocation16], 0  ;;  %s1192_s23 = smov [#allocation6]   ;;  %s1193_s25 = smov [#allocation9]  }
   0x9   :  { %s50_s24 = sshll.u32 %s1192_s23, 4  ;;  %s74_s26 = sshll.u32 %s1193_s25, 4  ;;  %s51_s24 = int_to_ptr.vmem [resolvable:$true] %s50_s24  ;;  %s75_s26 = int_to_ptr.vmem [resolvable:$true] %s74_s26 }
   0xa   :  { %s1004_s29 = scalar_lea.hbm %s1529_s2, 32 }
   0xb   :  { %p1005_p0 = scmp.ne.s32.totalorder %s1529_s2, %s1004_s29  ;;  %p1008_p1 = scmp.lt.u32.totalorder %s1004_s29, %s1529_s2 }
   0xd   :  { %p1010_p2 = pnand %p1008_p1, %p1005_p0 }
   0xf   :  { %1013 = shalt.err (!%p1010_p2)
}
  0x10   :  { %s1014_s18 = scalar_lea.vmem %s51_s24, 32  ;;  %p1019_p4 = scmp.lt.s32.totalorder %s51_s24, %s51_s24 }
  0x11   :  { %p1015_p3 = scmp.ne.s32.totalorder %s51_s24, %s1014_s18  ;;  %p1020_p5 = scmp.lt.s32.totalorder %s1014_s18, %s1014_s18 }
  0x13   :  { %p1021_p6 = por %p1020_p5, %p1019_p4 }
  0x15   :  { %p1022_p7 = pnand %p1021_p6, %p1015_p3 }
  0x17   :  { %1025 = shalt.err (!%p1022_p7)
}
  0x18   :  { %53 = dma.hbm_to_vmem [thread:$0]  %s1529_s2, 32, %s51_s24, [#allocation7]  }
  0x19   :  { %s1026_s23 = scalar_lea.hbm %s1533_s6, 16 }
  0x1a   :  { %p1027_p8 = scmp.ne.s32.totalorder %s1533_s6, %s1026_s23  ;;  %p1030_p9 = scmp.lt.u32.totalorder %s1026_s23, %s1533_s6 }
  0x1c   :  { %p1032_p10 = pnand %p1030_p9, %p1027_p8 }
  0x1e   :  { %1035 = shalt.err (!%p1032_p10)
}
  0x1f   :  { %s1036_s30 = scalar_lea.vmem %s75_s26, 16  ;;  %s1040_s0 = scalar_lea.vmem %s75_s26, 32 }
  0x20   :  { %p1037_p11 = scmp.ne.s32.totalorder %s75_s26, %s1036_s30  ;;  %p1041_p12 = scmp.lt.s32.totalorder %s75_s26, %s75_s26 }
  0x21   :  { %p1042_p13 = scmp.lt.s32.totalorder %s1040_s0, %s1036_s30 }
  0x23   :  { %p1043_p0 = por %p1042_p13, %p1041_p12 }
  0x25   :  { %p1044_p1 = pnand %p1043_p0, %p1037_p11 }
  0x27   :  { %1047 = shalt.err (!%p1044_p1)
}
  0x28   :  { %77 = dma.hbm_to_vmem [thread:$0]  %s1533_s6, 16, %s75_s26, [#allocation10]  }
  0x29   :  { %s1194_s7 = smov [#allocation3]   ;;  %s1048_s20 = scalar_lea.hbm %s1528_s1, 256 }
  0x2a   :  { %s37_s17 = sshll.u32 %s1194_s7, 4  ;;  %p1049_p2 = scmp.ne.s32.totalorder %s1528_s1, %s1048_s20  ;;  %s38_s17 = int_to_ptr.vmem [resolvable:$true] %s37_s17 }
  0x2b   :  { %p1052_p3 = scmp.lt.u32.totalorder %s1048_s20, %s1528_s1 }
  0x2d   :  { %p1054_p4 = pnand %p1052_p3, %p1049_p2 }
  0x2f   :  { %1057 = shalt.err (!%p1054_p4)
}
  0x30   :  { %s1058_s27 = scalar_lea.vmem %s38_s17, 256  ;;  %p1063_p6 = scmp.lt.s32.totalorder %s38_s17, %s38_s17 }
  0x31   :  { %p1059_p5 = scmp.ne.s32.totalorder %s38_s17, %s1058_s27  ;;  %p1064_p7 = scmp.lt.s32.totalorder %s1058_s27, %s1058_s27 }
  0x33   :  { %p1065_p8 = por %p1064_p7, %p1063_p6 }
  0x35   :  { %p1066_p9 = pnand %p1065_p8, %p1059_p5 }
  0x37   :  { %1069 = shalt.err (!%p1066_p9)
}
  0x38   :  { %s1195_s6 = smov 128   ;;  %s1196_s26 = smov 8  }
  0x39   :  { %43 = dma.hbm_to_vmem [thread:$0]  %s1528_s1, 256, %s38_s17, [#allocation4], %s1195_s6, %s1195_s6, %s1196_s26  }
  0x3a   :  { %s1197_s30 = smov [#allocation8]   ;;  %s1198_s2 = smov [#allocation11]  }
  0x3b   :  { %s64_s0 = sshll.u32 %s1197_s30, 4  ;;  %s88_s24 = sshll.u32 %s1198_s2, 4  ;;  %s65_s0 = int_to_ptr.vmem [resolvable:$true] %s64_s0  ;;  %s89_s24 = int_to_ptr.vmem [resolvable:$true] %s88_s24 }
  0x3c   :  { %s1070_s19 = scalar_lea.hbm %s1532_s5, 16 }
  0x3d   :  { %p1071_p10 = scmp.ne.s32.totalorder %s1532_s5, %s1070_s19  ;;  %p1074_p11 = scmp.lt.u32.totalorder %s1070_s19, %s1532_s5 }
  0x3f   :  { %p1076_p12 = pnand %p1074_p11, %p1071_p10 }
  0x41   :  { %1079 = shalt.err (!%p1076_p12)
}
  0x42   :  { %s1080_s1 = scalar_lea.vmem %s65_s0, 16  ;;  %s1084_s17 = scalar_lea.vmem %s65_s0, 32 }
  0x43   :  { %p1081_p13 = scmp.ne.s32.totalorder %s65_s0, %s1080_s1  ;;  %p1085_p0 = scmp.lt.s32.totalorder %s65_s0, %s65_s0 }
  0x44   :  { %p1086_p1 = scmp.lt.s32.totalorder %s1084_s17, %s1080_s1 }
  0x46   :  { %p1087_p2 = por %p1086_p1, %p1085_p0 }
  0x48   :  { %p1088_p3 = pnand %p1087_p2, %p1081_p13 }
  0x4a   :  { %1091 = shalt.err (!%p1088_p3)
}
  0x4b   :  { %67 = dma.hbm_to_vmem [thread:$0]  %s1532_s5, 16, %s65_s0, [#allocation7]  }
  0x4c   :  { %s1092_s30 = scalar_lea.hbm %s1536_s9, 16 }
  0x4d   :  { %p1093_p4 = scmp.ne.s32.totalorder %s1536_s9, %s1092_s30  ;;  %p1096_p5 = scmp.lt.u32.totalorder %s1092_s30, %s1536_s9 }
  0x4f   :  { %p1098_p6 = pnand %p1096_p5, %p1093_p4 }
  0x51   :  { %1101 = shalt.err (!%p1098_p6)
}
  0x52   :  { %s1102_s20 = scalar_lea.vmem %s89_s24, 16  ;;  %s1106_s21 = scalar_lea.vmem %s89_s24, 32 }
  0x53   :  { %p1103_p7 = scmp.ne.s32.totalorder %s89_s24, %s1102_s20  ;;  %p1107_p8 = scmp.lt.s32.totalorder %s89_s24, %s89_s24 }
  0x54   :  { %p1108_p9 = scmp.lt.s32.totalorder %s1106_s21, %s1102_s20 }
  0x56   :  { %p1109_p10 = por %p1108_p9, %p1107_p8 }
  0x58   :  { %p1110_p11 = pnand %p1109_p10, %p1103_p7 }
  0x5a   :  { %1113 = shalt.err (!%p1110_p11)
}
  0x5b   :  { %91 = dma.hbm_to_vmem [thread:$0]  %s1536_s9, 16, %s89_s24, [#allocation10]  }
  0x5c   :  { %s1199_s22 = smov [#allocation12]   ;;  %s1114_s25 = scalar_lea.hbm %s1540_s13, 512 }
  0x5d   :  { %s103_s23 = sshll.u32 %s1199_s22, 4  ;;  %p1115_p12 = scmp.ne.s32.totalorder %s1540_s13, %s1114_s25  ;;  %s104_s23 = int_to_ptr.vmem [resolvable:$true] %s103_s23 }
  0x5e   :  { %p1118_p13 = scmp.lt.u32.totalorder %s1114_s25, %s1540_s13 }
  0x60   :  { %p1120_p0 = pnand %p1118_p13, %p1115_p12 }
  0x62   :  { %1123 = shalt.err (!%p1120_p0)
}
  0x63   :  { %s1124_s2 = scalar_lea.vmem %s104_s23, 512  ;;  %p1129_p2 = scmp.lt.s32.totalorder %s104_s23, %s104_s23 }
  0x64   :  { %p1125_p1 = scmp.ne.s32.totalorder %s104_s23, %s1124_s2  ;;  %p1130_p3 = scmp.lt.s32.totalorder %s1124_s2, %s1124_s2 }
  0x66   :  { %p1131_p4 = por %p1130_p3, %p1129_p2 }
  0x68   :  { %p1132_p5 = pnand %p1131_p4, %p1125_p1 }
  0x6a   :  { %1135 = shalt.err (!%p1132_p5)
}
  0x6b   :  { %109 = dma.hbm_to_vmem [thread:$0]  %s1540_s13, 512, %s104_s23, [#allocation13], %s1195_s6, %s1195_s6, %s1196_s26  }
  0x6c   :  { %1180 = dma.done.wait [#allocation4], 256  }
  0x6d   :  { %1181 = vsyncadd [#allocation4], 4294967040 }
  0x6e   :  { %1182 = dma.done.wait [#allocation7], 48  }
  0x6f   :  { %1183 = vsyncadd [#allocation7], 4294967248 }
  0x70   :  { %1184 = dma.done.wait [#allocation10], 32  }
  0x71   :  { %1185 = vsyncadd [#allocation10], 4294967264 }
  0x72   :  { %1186 = dma.done.wait [#allocation13], 512  }
  0x73   :  { %1187 = vsyncadd [#allocation13], 4294966784  ;;  %v1200_v1 = vmov 0.0|0.0   ;;  %vm1201_vm0 = vmmov 0   ;;  %v1202_v2 = vmov 0.0   ;;  %v134_v3 = vld [vmem:[%s1530_s3] sm:$0xff]  ;;  %v301_v34 = vlaneseq }
  0x74   :  { %935 = vmatprep.subr.bf16.mxu0 %v1200_v1  ;;  %869 = vmatprep.mubr.msk.f32.mxu0 %vm1201_vm0, %v1202_v2  ;;  %v135_v4 = vld [vmem:[%s1530_s3 + $0x8] sm:$0xff]  ;;  %v212_v5 = vld [vmem:[%s1531_s4] sm:$0xff]  ;;  %v136_v8 = vld [vmem:[%s1530_s3 + $0x10] sm:$0xff]  ;;  %vm138_vm1 = vcmask 261120   ;;  %s1545_s7 = sld [smem:[#allocation23_spill]]  ;;  %v1203_v31 = vmov 0  }
  0x75   :  { %v936_v6 = vpack.c.bf16 %v135_v4, %v134_v3  ;;  %v213_v7 = vld [vmem:[%s1531_s4 + $0x8] sm:$0xff]  ;;  %v137_v9 = vld [vmem:[%s1530_s3 + $0x18] sm:$0xff]  ;;  %v214_v11 = vld [vmem:[%s1531_s4 + $0x10] sm:$0xff]  ;;  %998 = vset.pattern.permute.xlu1 %v1203_v31  ;;  %999 = vset.pattern.permute.xlu0 %v1203_v31  ;;  %v1204_v32 = vmov 1966171168   ;;  %v1438_v36 = vshrl.u32 %v301_v34, 7 }
  0x76   :  { %v941_v10 = vpack.c.bf16 %v213_v7, %v212_v5  ;;  %v215_v12 = vld [vmem:[%s1531_s4 + $0x18] sm:$0xff]  ;;  %v939_v13 = vpack.c.bf16 %v137_v9, %v136_v8  ;;  %v131_v15 = vld [vmem:[#allocation3] sm:$0xff]  ;;  %v132_v20 = vld [vmem:[#allocation3 + $0x8] sm:$0xff]  ;;  %v299_v33 = vunpack.c.l.s4 %v1204_v32  ;;  %vm352_vm2 = vcmask 523264   ;;  %s1205_s5 = smov [#allocation15]  }
  0x77   :  { %937 = vmatpush3.bf16.msra.mxu0 %v936_v6  ;;  %v945_v14 = vpack.c.bf16 %v215_v12, %v214_v11  ;;  %v400_v16 = vld [vmem:[%s1535_s8] sm:$0xff]  ;;  %v401_v17 = vld [vmem:[%s1535_s8 + $0x8] sm:$0xff]  ;;  %880 = vmatprep.mubr.msk.f32.mxu1 %vm138_vm1, %v131_v15  ;;  %v402_v21 = vld [vmem:[%s1535_s8 + $0x10] sm:$0xff]  ;;  %v1442_v41 = vsub.s32 0, %v1438_v36  ;;  %v375_v61 = vand.u32 127, %v301_v34  ;;  %vm384_vm3 = vcmask 1041409  }
  0x78   :  { %938 = vmatprep.subr.bf16.mxu0 %v1200_v1  ;;  %942 = vmatprep.subr.bf16.mxu1 %v941_v10  ;;  %v949_v18 = vpack.c.bf16 %v401_v17, %v400_v16  ;;  %v403_v22 = vld [vmem:[%s1535_s8 + $0x18] sm:$0xff]  ;;  %v404_v24 = vld [vmem:[%s1535_s8 + $0x20] sm:$0xff]  ;;  %v405_v25 = vld [vmem:[%s1535_s8 + $0x28] sm:$0xff]  ;;  %v300_v35 = vunpack.c.0.s8 %v299_v33  ;;  %vm388_vm5 = vcmask 58368   ;;  %s792_s0 = sshll.u32 %s1205_s5, 4  ;;  %s793_s0 = int_to_ptr.vmem [resolvable:$true] %s792_s0 }
  0x79   :  { %944 = vmatpush3.bf16.msra.mxu1 %v941_v10  ;;  %v953_v23 = vpack.c.bf16 %v403_v22, %v402_v21  ;;  %v957_v26 = vpack.c.bf16 %v405_v25, %v404_v24  ;;  %v406_v27 = vld [vmem:[%s1535_s8 + $0x30] sm:$0xff]  ;;  %v407_v28 = vld [vmem:[%s1535_s8 + $0x38] sm:$0xff]  ;;  %v816_v30 = vld [vmem:[#allocation2] ss:$0 sm:$0xff]  ;;  %v378_v0 = vsub.s32 %v375_v61, %v1438_v36  ;;  %s1136_s22 = scalar_lea.vmem %s793_s0, 256  ;;  %p1141_p7 = scmp.lt.s32.totalorder %s793_s0, %s793_s0 }
  0x7a   :  { %946 = vmatprep.subr.bf16.mxu1 %v945_v14  ;;  %v1411_v19 = vld [vmem:[%s1545_s7] sm:$0x3]  ;;  %v961_v29 = vpack.c.bf16 %v407_v28, %v406_v27  ;;  %366 = vperm.xlu1 %998, %v816_v30   ;;  %v303_v37 = vsub.s32 %v300_v35, %v1438_v36  ;;  %v814_v48 = vld [vmem:[#allocation8] ss:$0 sm:$0xff]  ;;  %v815_v53 = vld [vmem:[#allocation9] ss:$0 sm:$0xff]  ;;  %p1137_p6 = scmp.ne.s32.totalorder %s793_s0, %s1136_s22  ;;  %p1142_p8 = scmp.lt.s32.totalorder %s1136_s22, %s1136_s22 }
  0x7b   :  { %940 = vmatpush3.bf16.msra.mxu0 %v939_v13  ;;  %v133_v5 = vld [vmem:[#allocation6] sm:$0x3]  ;;  %v817_v12 = vld [vmem:[#allocation11] ss:$0 sm:$0xff]  ;;  %v530_v24 = vld [vmem:[%s1538_s11] sm:$0xff]  ;;  %v505_v35 = vsub.s32 1, %v1438_v36 }
  0x7c   :  { %950 = vmatprep.subr.bf16.mxu0 %v949_v18  ;;  %vm371_vm4 = vcmp.gt.f32.partialorder %v133_v5, 0.5  ;;  %v531_v25 = vld [vmem:[%s1538_s11 + $0x8] sm:$0xff]  ;;  %v532_v27 = vld [vmem:[%s1538_s11 + $0x10] sm:$0xff]  ;;  %v533_v28 = vld [vmem:[%s1538_s11 + $0x18] sm:$0xff]  ;;  %p1143_p9 = por %p1142_p8, %p1141_p7 }
  0x7d   :  { %948 = vmatpush3.bf16.msra.mxu1 %v945_v14  ;;  %v526_v32 = vld [vmem:[%s1537_s10] sm:$0xff]  ;;  %v527_v33 = vld [vmem:[%s1537_s10 + $0x8] sm:$0xff] }
  0x7e   :  { %870 = vmatmul.mubr.msk.f32.vlgmr.msra.gmra.mrb[0].mxu0 %vm138_vm1, %v1411_v19  ;;  %965 = vmatprep.subr.bf16.mxu1 %v1200_v1  ;;  %v688_v61 = vld [vmem:[#allocation12] sm:$0xff]  ;;  %p1144_p10 = pnand %p1143_p9, %p1137_p6 }
  0x7f   :  { %952 = vmatpush3.bf16.msra.mxu0 %v949_v18 }
  0x80   :  { %881 = vmatmul.mubr.msk.f32.vlgmr.msra.gmra.mrb[0].mxu1 %vm138_vm1, %v132_v20  ;;  %954 = vmatprep.subr.bf16.mxu0 %v953_v23 }
  0x81   :  { %910 = vmatprep.mubr.msk.f32.mxu1 %vm1201_vm0, %v1202_v2 }
  0x83   :  { %956 = vmatpush3.bf16.msra.mxu0 %v953_v23 }
  0x84   :  { %958 = vmatprep.subr.bf16.mxu0 %v957_v26 }
  0x87   :  { %960 = vmatpush3.bf16.msra.mxu0 %v957_v26  ;;  %v966_v26 = vpack.c.bf16 %v531_v25, %v530_v24 }
  0x88   :  { %962 = vmatprep.subr.bf16.mxu0 %v961_v29 }
  0x89   :  { %967 = vmatpush3.bf16.msra.mxu1 %v966_v26 }
  0x8a   :  { %968 = vmatprep.subr.bf16.mxu1 %v1200_v1 }
  0x8b   :  { %964 = vmatpush3.bf16.msra.mxu0 %v961_v29  ;;  %v969_v29 = vpack.c.bf16 %v533_v28, %v532_v27 }
  0x8c   :  { %977 = vmatprep.subr.bf16.mxu0 %v1200_v1 }
  0x8d   :  { %970 = vmatpush3.bf16.msra.mxu1 %v969_v29 }
  0x8e   :  { %971 = vmatprep.subr.bf16.mxu1 %v1200_v1 }
  0x90   :  { %911 = vmatmul.mubr.msk.f32.vlgmr.msra.gmra.mrb[2].mxu1 %vm138_vm1, %v1411_v19 }
  0x91   :  { %921 = vmatprep.mubr.msk.f32.mxu1 %vm1201_vm0, %v1202_v2 }
  0xf9   :  { %v367_v62 = vpop.permute.xlu1 %366 }
 0x151   :  { %v208_v38 = vpop.f32.mrb[0].mxu0 }
 0x152   :  { %v304_v39 = vrot.slane %v208_v38, %v303_v37  ;;  %v871_v40 = vpop.f32.mrb[1].mxu0  ;;  %v528_v38 = vld [vmem:[%s1537_s10 + $0x10] sm:$0xff] }
 0x153   :  { %v882_v42 = vpop.f32.mrb[0].mxu1 }
 0x154   :  { %v305_v43 = vcombine.high %v304_v39, %v304_v39  ;;  %v312_v44 = vrot.slane %v304_v39, %v303_v37  ;;  %v288_v45 = vpop.f32.mrb[1].mxu1  ;;  %v529_v39 = vld [vmem:[%s1537_s10 + $0x18] sm:$0xff] }
 0x155   :  { %v975_v40 = vpack.c.bf16 %v529_v39, %v528_v38 }
 0x156   :  { %v319_v46 = vrot.slane %v305_v43, %v303_v37  ;;  %v323_v47 = vrot.slane %v312_v44, %v1442_v41  ;;  %v972_v37 = vpack.c.bf16 %v527_v33, %v526_v32 }
 0x158   :  { %v327_v49 = vrot.slane %v319_v46, %v1442_v41  ;;  %v330_v50 = vadd.f32 %v323_v47, %v288_v45  ;;  %973 = vmatpush3.bf16.msra.mxu1 %v972_v37 }
 0x159   :  { %974 = vmatprep.subr.bf16.mxu1 %v1200_v1 }
 0x15a   :  { %v331_v51 = vadd.f32 %v882_v42, %v327_v49  ;;  %v339_v52 = vadd.f32 %v814_v48, %v330_v50 }
 0x15c   :  { %v340_v54 = vadd.f32 %v814_v48, %v331_v51  ;;  %v341_v55 = vmax.f32 %v339_v52, 0.0  ;;  %976 = vmatpush3.bf16.msra.mxu1 %v975_v40 }
 0x15e   :  { %v342_v56 = vmax.f32 %v340_v54, 0.0  ;;  %899 = vmatprep.mubr.msk.f32.mxu0 %vm352_vm2, %v341_v55  ;;  %v350_v57 = vmul.f32 %v815_v53, %v341_v55 }
 0x160   :  { %900 = vmatmul.mubr.msk.f32.vlgmr.msra.gmra.mrb[2].mxu0 %vm352_vm2, %v342_v56  ;;  %v353_v58 = vsel %vm352_vm2, %v350_v57, 0.0  ;;  %v351_v59 = vmul.f32 %v815_v53, %v342_v56 }
 0x161   :  { %354 = vadd.xlane.f32.xlu0 %v353_v58  ;;  %932 = vmatprep.mubr.msk.f32.mxu0 %vm1201_vm0, %v1202_v2 }
 0x162   :  { %v356_v60 = vsel %vm352_vm2, %v351_v59, 0.0 }
 0x163   :  { %v600_v59 = vpop.f32.mrb[2].mxu1 }
 0x165   :  { %357 = vadd.xlane.f32.xlu0 %v356_v60  ;;  %v912_v60 = vpop.f32.mrb[3].mxu1 }
 0x1ee   :  { %v355_v63 = vpop.xlane.xlu0 %354 }
 0x1ef   :  { %v369_v3 = vadd.f32 %v367_v62, %v355_v63 }
 0x1f1   :  { %v379_v7 = vrot.slane %v369_v3, %v378_v0  ;;  %v691_v3 = vld [vmem:[#allocation12 + $0x18] sm:$0xff] }
 0x1f2   :  { %v358_v4 = vpop.xlane.xlu0 %357 }
 0x1f3   :  { %v370_v6 = vadd.f32 %v367_v62, %v358_v4  ;;  %v689_v62 = vld [vmem:[#allocation12 + $0x8] sm:$0xff] }
 0x1f4   :  { %v978_v63 = vpack.c.bf16 %v689_v62, %v688_v61 }
 0x1f5   :  { %v383_v8 = vrot.slane %v370_v6, %v378_v0  ;;  %v690_v0 = vld [vmem:[#allocation12 + $0x10] sm:$0xff]  ;;  %v822_v6 = vld [vmem:[%s1539_s12] ss:$0 sm:$0xff] }
 0x1f6   :  { %979 = vmatpush3.bf16.msra.mxu0 %v978_v63  ;;  %v981_v4 = vpack.c.bf16 %v691_v3, %v690_v0 }
 0x1f7   :  { %v385_v9 = vsel %vm384_vm3, %v383_v8, %v379_v7  ;;  %980 = vmatprep.subr.bf16.mxu0 %v1200_v1 }
 0x1f8   :  { %v387_v10 = vsel %vm371_vm4, -1e+09, %v385_v9 }
 0x1f9   :  { %v389_v11 = vsel %vm388_vm5, %v387_v10, -inf }
 0x1fa   :  { %390 = vmax.xlane.f32.xlu1 %v389_v11  ;;  %982 = vmatpush3.bf16.msra.mxu0 %v981_v4 }
 0x233   :  { %v901_v13 = vpop.f32.mrb[2].mxu0 }
 0x234   :  { %v493_v14 = vadd.f32 %v901_v13, %v817_v12  ;;  %v487_v15 = vpop.f32.mrb[3].mxu0 }
 0x235   :  { %v488_v16 = vadd.f32 %v817_v12, %v487_v15 }
 0x236   :  { %776 = vst.msk [vmem:[#allocation15 + $0x8] sm:$0xff] %vm138_vm1, %v493_v14 }
 0x237   :  { %775 = vst.msk [vmem:[#allocation15] sm:$0xff] %vm138_vm1, %v488_v16 }
 0x287   :  { %v391_v17 = vpop.xlane.xlu1 %390 }
 0x288   :  { %v392_v18 = vsub.f32 %v387_v10, %v391_v17 }
 0x28a   :  { %v393_v20 = vmul.f32 1.442695, %v392_v18 }
 0x28c   :  { %1000 = vpow2.f32 %v393_v20 }
 0x296   :  { %v1001_v21 = vpop.eup %1000 }
 0x297   :  { %v395_v22 = vsel %vm388_vm5, %v1001_v21, 0.0 }
 0x298   :  { %396 = vadd.xlane.f32.xlu0 %v395_v22 }
 0x325   :  { %v397_v23 = vpop.xlane.xlu0 %396 }
 0x326   :  { %1002 = vrcp.f32 %v397_v23 }
 0x330   :  { %v1003_v30 = vpop.eup %1002 }
 0x331   :  { %v399_v31 = vmul.f32 %v1003_v30, %v1001_v21 }
 0x333   :  { %v499_v34 = vrot.slane %v399_v31, %v1442_v41  ;;  %v506_v36 = vrot.slane %v399_v31, %v505_v35 }
 0x335   :  { %501 = vbcast.lane.b32.xlu0 %v499_v34, 256 }
 0x339   :  { %508 = vbcast.lane.b32.xlu0 %v506_v36, 256 }
 0x3a7   :  { %v502_v41 = vpop.permute.xlu0 %501 }
 0x3a8   :  { %v510_v42 = vmul.f32 %v502_v41, %v488_v16 }
 0x3aa   :  { %v512_v43 = vsel %vm138_vm1, %v510_v42, 0.0 }
 0x3ab   :  { %v513_v44 = vrot.slane %v512_v43, 4  ;;  %v509_v45 = vpop.permute.xlu0 %508 }
 0x3ac   :  { %v511_v46 = vmul.f32 %v509_v45, %v493_v14 }
 0x3ad   :  { %v514_v47 = vadd.f32 %v513_v44, %v512_v43 }
 0x3ae   :  { %v519_v48 = vsel %vm138_vm1, %v511_v46, 0.0 }
 0x3af   :  { %v515_v49 = vrot.slane %v514_v47, 2  ;;  %v520_v50 = vrot.slane %v519_v48, 4 }
 0x3b1   :  { %v516_v51 = vadd.f32 %v515_v49, %v514_v47  ;;  %v521_v52 = vadd.f32 %v520_v50, %v519_v48 }
 0x3b3   :  { %v522_v53 = vrot.slane %v521_v52, 2  ;;  %v517_v2 = vrot.slane %v516_v51, 1 }
 0x3b5   :  { %v523_v54 = vadd.f32 %v522_v53, %v521_v52  ;;  %v518_v56 = vadd.f32 %v517_v2, %v516_v51 }
 0x3b7   :  { %v524_v55 = vrot.slane %v523_v54, 1 }
 0x3b9   :  { %v525_v57 = vadd.f32 %v524_v55, %v523_v54 }
 0x3bb   :  { %v606_v58 = vsel %vm384_vm3, %v525_v57, %v518_v56 }
 0x3bc   :  { %922 = vmatmul.mubr.msk.f32.vlgmr.msra.gmra.mrb[4].mxu1 %vm138_vm1, %v606_v58 }
 0x48f   :  { %v675_v5 = vpop.f32.mrb[4].mxu1 }
 0x490   :  { %v676_v7 = vadd.f32 %v675_v5, %v600_v59  ;;  %v923_v8 = vpop.f32.mrb[5].mxu1 }
 0x492   :  { %v686_v9 = vadd.f32 %v822_v6, %v676_v7 }
 0x494   :  { %v687_v10 = vmax.f32 %v686_v9, 0.0 }
 0x496   :  { %933 = vmatmul.mubr.msk.f32.vlgmr.msra.gmra.mrb[4].mxu0 %vm138_vm1, %v687_v10 }
 0x497   :  { %1147 = shalt.err (!%p1144_p10)
}
 0x498   :  { %s1148_s12 = scalar_lea.hbm %s1543_s16, 256 }
 0x499   :  { %p1149_p11 = scmp.ne.s32.totalorder %s1543_s16, %s1148_s12  ;;  %p1152_p12 = scmp.lt.u32.totalorder %s1148_s12, %s1543_s16 }
 0x49b   :  { %p1154_p13 = pnand %p1152_p12, %p1149_p11 }
 0x49d   :  { %1157 = shalt.err (!%p1154_p13)
}
 0x49e   :  { %798 = dma.vmem_to_hbm [thread:$0]  %s793_s0, 256, %s1543_s16, [#allocation16], %s1195_s6, %s1195_s6, %s1196_s26   ;;  %vm773_vm6 = vcmask 254976  }
 0x49f   :  { %v823_v1 = vld [vmem:[%s1541_s14] ss:$0 sm:$0xff]  ;;  %s1206_s3 = smov [#allocation14]  }
 0x4a0   :  { %s783_s9 = sshll.u32 %s1206_s3, 4  ;;  %s784_s9 = int_to_ptr.vmem [resolvable:$true] %s783_s9 }
 0x4a1   :  { %s1158_s4 = scalar_lea.vmem %s784_s9, 32  ;;  %p1163_p1 = scmp.lt.s32.totalorder %s784_s9, %s784_s9 }
 0x4a2   :  { %p1159_p0 = scmp.ne.s32.totalorder %s784_s9, %s1158_s4  ;;  %p1164_p2 = scmp.lt.s32.totalorder %s1158_s4, %s1158_s4 }
 0x4a4   :  { %p1165_p3 = por %p1164_p2, %p1163_p1 }
 0x4a6   :  { %p1166_p4 = pnand %p1165_p3, %p1159_p0 }
 0x569   :  { %v768_v11 = vpop.f32.mrb[4].mxu0 }
 0x56a   :  { %v769_v12 = vadd.f32 %v823_v1, %v768_v11  ;;  %v934_v13 = vpop.f32.mrb[5].mxu0 }
 0x56c   :  { %v772_v14 = vadd.f32 %v769_v12, %v1411_v19 }
 0x56e   :  { %774 = vst.msk [vmem:[#allocation14] sm:$0x3] %vm773_vm6, %v772_v14 }
 0x56f   :  { %1169 = shalt.err (!%p1166_p4)
}
 0x570   :  { %s1170_s14 = scalar_lea.hbm %s1542_s15, 32 }
 0x571   :  { %p1171_p5 = scmp.ne.s32.totalorder %s1542_s15, %s1170_s14  ;;  %p1174_p6 = scmp.lt.u32.totalorder %s1170_s14, %s1542_s15 }
 0x573   :  { %p1176_p7 = pnand %p1174_p6, %p1171_p5 }
 0x575   :  { %1179 = shalt.err (!%p1176_p7)
}
 0x576   :  { %786 = dma.vmem_to_hbm [thread:$0]  %s784_s9, 32, %s1542_s15, [#allocation5]  }
 0x577   :  { %1188 = dma.done.wait [#allocation5], 32  }
 0x578   :  { %1189 = vsyncadd [#allocation5], 4294967264 }
 0x579   :  { %1190 = dma.done.wait [#allocation16], 256  }
 0x57a   :  { %1191 = vsyncadd [#allocation16], 4294967040 }
 0x57b   :  { %805 = vsyncpa [#allocation4], 1 }
 0x57c   :  { %806 = vsyncpa [#allocation7], 1 }
 0x57d   :  { %807 = vsyncpa [#allocation10], 1 }
 0x57e   :  { %808 = vsyncpa [#allocation13], 1 }
 0x57f   :  { %809 = vsyncpa [#allocation5], 1 }
 0x580   :  { %810 = vsyncpa [#allocation16], 1 }

</bundles_post_ra>
